<compile_context>
chip_gen: v5e
topology: v5e:2x2
jax: 0.10.0
libtpu: 0.0.40
codegen_flags: <defaults>
</compile_context>

<pallas_src>
import functools

import jax
import jax.numpy as jnp
from jax.experimental import pallas as pl
from jax.experimental.pallas import tpu as pltpu


BN_EPS = 1e-5
NEG_SLOPE = 0.2


def _round_up(x, m):
    return (x + m - 1) // m * m


def _store_stats(stats_ref, v):
    # stats_ref block: (1, 2, c_blk) f32 ; v: (m_blk, c_blk) f32
    c = v.shape[-1]
    stats_ref[:, 0:1, :] = jnp.sum(v, axis=0, keepdims=True).reshape(1, 1, c)
    stats_ref[:, 1:2, :] = jnp.sum(v * v, axis=0, keepdims=True).reshape(1, 1, c)


# ---------------------------------------------------------------------------
# Kernel A: conv-as-matmul + per-M-block BN partial statistics.
#   patches_ref: (m_blk, K)      bf16  im2col tile (K = 16*Cin)
#   w_ref:       (K, c_blk)      bf16  reshaped conv weights
#   conv_ref:    (m_blk, c_blk)  bf16  conv output tile (downcast of f32 accum)
#   stats_ref:   (1, 2, c_blk)   f32   per-(M block) [sum; sum-of-squares] partials
# grid = (n_m [parallel], n_c [parallel])
# ---------------------------------------------------------------------------
def _conv_stats_kernel(patches_ref, w_ref, conv_ref, stats_ref, *, m_real, need_mask):
    # One big matmul on the MXU: K = 16*Cin, f32 accumulation.
    acc = jnp.dot(patches_ref[...], w_ref[...],
                  preferred_element_type=jnp.float32)
    conv_ref[...] = acc.astype(jnp.bfloat16)

    if need_mask:
        # Zero-padding of the flattened (N*Ho*Wo) axis lives only in the LAST M block;
        # every other block sums the accumulator directly (no masking passes).
        mi = pl.program_id(0)
        m_blk = conv_ref.shape[0]
        last = pl.num_programs(0) - 1

        @pl.when(mi < last)
        def _():
            _store_stats(stats_ref, acc)

        @pl.when(mi == last)
        def _():
            row = mi * m_blk + jax.lax.broadcasted_iota(jnp.int32, acc.shape, 0)
            _store_stats(stats_ref, jnp.where(row < m_real, acc, 0.0))
    else:
        _store_stats(stats_ref, acc)


# ---------------------------------------------------------------------------
# Kernel B: folded BatchNorm (per-channel scale/shift) + LeakyReLU(0.2).
#   conv_ref: (mb_blk, Cout_p) bf16 ; scale/shift: (1, Cout_p) f32 ; out: f32
# ---------------------------------------------------------------------------
def _bn_lrelu_kernel(conv_ref, scale_ref, shift_ref, out_ref):
    y = conv_ref[...].astype(jnp.float32) * scale_ref[...] + shift_ref[...]
    out_ref[...] = jnp.where(y > 0, y, NEG_SLOPE * y)


@functools.partial(jax.jit, static_argnames=("stride",))
def basic_discriminator_block(x_nchw, weight, bias, gamma, beta, stride=2):
    """Forward pass of BasicDiscriminatorBlock.

    x_nchw: (N, Cin, H, W) float32   (PyTorch NCHW convention)
    weight: (Cout, Cin, 4, 4)        (PyTorch Conv2d weight layout)
    bias:   (Cout,)                  (unused: cancels exactly under training-mode BN)
    gamma:  (Cout,)   BatchNorm2d weight
    beta:   (Cout,)   BatchNorm2d bias
    returns (N, Cout, Ho, Wo) float32
    """
    del bias  # conv bias cancels exactly through training-mode BatchNorm
    assert stride == 2, "kernel specialised for the module default stride=2"
    n, cin, h, w = x_nchw.shape
    cout = weight.shape[0]
    ho = (h + 2 - 4) // 2 + 1
    wo = (w + 2 - 4) // 2 + 1
    m = n * ho * wo
    k = 16 * cin

    # ---- layout glue: NCHW -> NHWC, zero-pad by 1, im2col (16 taps, stride 2) ----
    x = jnp.transpose(x_nchw, (0, 2, 3, 1)).astype(jnp.float32)
    xp = jnp.pad(x, ((0, 0), (1, 1), (1, 1), (0, 0)))
    cols = [xp[:, kh:kh + 2 * ho:2, kw:kw + 2 * wo:2, :]
            for kh in range(4) for kw in range(4)]
    patches = jnp.concatenate(cols, axis=-1).reshape(m, k)
    # bf16 matmul operands (f32 accumulation in-kernel); BN stats math stays f32.
    patches = patches.astype(jnp.bfloat16)

    # (Cout, Cin, 4, 4) -> (kh, kw, cin, cout) -> (16*Cin, Cout); matches patch K order.
    w2 = jnp.transpose(weight, (2, 3, 1, 0)).reshape(k, cout).astype(jnp.bfloat16)
    g2 = gamma.astype(jnp.float32)
    bt2 = beta.astype(jnp.float32)

    # ---- tile sizes / padding to TPU-friendly block shapes ----
    if cout <= 128:
        cout_p, c_blk = cout, cout
    else:
        cout_p = _round_up(cout, 128)
        # Fill the 256-wide MXU N dim on v6e/v7x and halve patch re-reads.
        c_blk = 256 if cout_p % 256 == 0 else 128

    m_blk = min(512, _round_up(m, 8))
    # VMEM guard (v7x has only 64 MiB physical): keep the double-buffered bf16
    # patches tile under ~12 MiB.
    # TODO(synk): for very large Cin, add a K grid axis with an f32 VMEM scratch
    # accumulator instead of shrinking m_blk.
    max_rows = max(8, ((12 << 20) // (4 * k)) // 8 * 8)
    m_blk = min(m_blk, max_rows)
    mp = _round_up(m, m_blk)

    if mp != m:
        patches = jnp.pad(patches, ((0, mp - m), (0, 0)))
    if cout_p != cout:
        w2 = jnp.pad(w2, ((0, 0), (0, cout_p - cout)))
        g2 = jnp.pad(g2, (0, cout_p - cout))          # padded lanes -> scale 0, output 0
        bt2 = jnp.pad(bt2, (0, cout_p - cout))

    n_m = mp // m_blk
    n_c = cout_p // c_blk

    # ---- Kernel A: conv matmul + per-channel sum / sumsq partials ----
    conv_out, stats_part = pl.pallas_call(
        functools.partial(_conv_stats_kernel, m_real=m, need_mask=(mp != m)),
        grid=(n_m, n_c),
        in_specs=[
            pl.BlockSpec((m_blk, k), lambda mi, ci: (mi, 0)),
            pl.BlockSpec((k, c_blk), lambda mi, ci: (0, ci)),
        ],
        out_specs=(
            pl.BlockSpec((m_blk, c_blk), lambda mi, ci: (mi, ci)),
            pl.BlockSpec((1, 2, c_blk), lambda mi, ci: (mi, 0, ci)),
        ),
        out_shape=(
            jax.ShapeDtypeStruct((mp, cout_p), jnp.bfloat16),
            jax.ShapeDtypeStruct((n_m, 2, cout_p), jnp.float32),
        ),
        compiler_params=pltpu.CompilerParams(
            dimension_semantics=("parallel", "parallel"),
            vmem_limit_bytes=48 * 1024 * 1024,
        ),
        cost_estimate=pl.CostEstimate(
            flops=2 * mp * k * cout_p,
            transcendentals=0,
            bytes_accessed=(mp * k * 2 + n_m * k * cout_p * 2
                            + mp * cout_p * 2 + n_m * 2 * cout_p * 4),
        ),
    )(patches, w2)

    # ---- fold training-mode BN batch statistics into per-channel scale/shift ----
    stats = jnp.sum(stats_part, axis=0)                      # (2, cout_p)
    mean = stats[0] / m
    var = jnp.maximum(stats[1] / m - mean * mean, 0.0)       # biased variance
    rstd = jax.lax.rsqrt(var + BN_EPS)
    scale = (g2 * rstd).reshape(1, cout_p)
    shift = (bt2 - mean * g2 * rstd).reshape(1, cout_p)
    # TODO(synk): PyTorch BatchNorm2d also updates running_mean/running_var as a
    # training side effect; the module's forward output does not expose them.

    # ---- Kernel B: normalize + affine + LeakyReLU over big full-width blocks ----
    tgt_elems = 1 << 21   # ~2M elems/block -> <=~24 MiB of double-buffered VMEM
    f_cap = max(1, tgt_elems // (m_blk * cout_p))
    f = 1
    for cand in range(min(n_m, f_cap), 0, -1):
        if n_m % cand == 0:
            f = cand
            break
    mb_blk = m_blk * f
    n_mb = mp // mb_blk

    out_flat = pl.pallas_call(
        _bn_lrelu_kernel,
        grid=(n_mb,),
        in_specs=[
            pl.BlockSpec((mb_blk, cout_p), lambda mi: (mi, 0)),
            pl.BlockSpec((1, cout_p), lambda mi: (0, 0)),
            pl.BlockSpec((1, cout_p), lambda mi: (0, 0)),
        ],
        out_specs=pl.BlockSpec((mb_blk, cout_p), lambda mi: (mi, 0)),
        out_shape=jax.ShapeDtypeStruct((mp, cout_p), jnp.float32),
        compiler_params=pltpu.CompilerParams(
            dimension_semantics=("parallel",),
            vmem_limit_bytes=48 * 1024 * 1024,
        ),
        cost_estimate=pl.CostEstimate(
            flops=3 * mp * cout_p,
            transcendentals=0,
            bytes_accessed=mp * cout_p * 2 + mp * cout_p * 4 + 2 * cout_p * 4,
        ),
    )(conv_out, scale, shift)

    # TODO(synk): the final NHWC->NCHW transpose is an extra XLA memory pass kept only
    # for PyTorch layout parity; return NHWC (or fold the transpose into Kernel B) if
    # the caller allows.
    out = out_flat[:m, :cout].reshape(n, ho, wo, cout)
    return jnp.transpose(out, (0, 3, 1, 2))


def _reference(x_nchw, weight, bias, gamma, beta):
    """Plain-JAX reference matching PyTorch forward semantics (training-mode BN)."""
    x = jnp.transpose(x_nchw, (0, 2, 3, 1)).astype(jnp.float32)       # NHWC
    w_hwio = jnp.transpose(weight, (2, 3, 1, 0)).astype(jnp.float32)  # HWIO
    y = jax.lax.conv_general_dilated(
        x, w_hwio, window_strides=(2, 2), padding=((1, 1), (1, 1)),
        dimension_numbers=("NHWC", "HWIO", "NHWC"))
    y = y + bias.reshape(1, 1, 1, -1)
    mean = jnp.mean(y, axis=(0, 1, 2), keepdims=True)
    var = jnp.mean(jnp.square(y - mean), axis=(0, 1, 2), keepdims=True)
    y = (y - mean) * jax.lax.rsqrt(var + BN_EPS)
    y = y * gamma.reshape(1, 1, 1, -1) + beta.reshape(1, 1, 1, -1)
    y = jnp.where(y > 0, y, NEG_SLOPE * y)
    return jnp.transpose(y, (0, 3, 1, 2))


if __name__ == "__main__":
    key = jax.random.PRNGKey(0)

    def run_case(n, cin, h, w, cout, case_key):
        k_x, k_w, k_b, k_g, k_bt = jax.random.split(case_key, 5)
        x = jax.random.normal(k_x, (n, cin, h, w), dtype=jnp.float32)
        weight = 0.1 * jax.random.normal(k_w, (cout, cin, 4, 4), dtype=jnp.float32)
        bias = 0.05 * jax.random.normal(k_b, (cout,), dtype=jnp.float32)
        gamma = 1.0 + 0.1 * jax.random.normal(k_g, (cout,), dtype=jnp.float32)
        beta = 0.1 * jax.random.normal(k_bt, (cout,), dtype=jnp.float32)

        out = jax.block_until_ready(
            basic_discriminator_block(x, weight, bias, gamma, beta))
        ref = jax.block_until_ready(_reference(x, weight, bias, gamma, beta))

        ho = (h + 2 - 4) // 2 + 1
        wo = (w + 2 - 4) // 2 + 1
        assert out.shape == (n, cout, ho, wo), out.shape
        err = float(jnp.max(jnp.abs(out - ref)))
        # bf16 matmul operands + bf16 conv intermediate vs f32 reference.
        assert err < 5e-2, err
        return err

    k1, k2 = jax.random.split(key)
    run_case(2, 4, 16, 16, 8, k1)       # main test shape
    run_case(1, 3, 15, 15, 16, k2)      # odd spatial size + padded-row masking path
    print("KERNEL_OK")
</pallas_src>

<mosaic_0001>
module attributes {stable_mosaic.version = 11 : i64} {
  func.func @_conv_stats_kernel(%arg0: i32, %arg1: i32, %arg2: memref<128x64xbf16, #tpu.memory_space<vmem>>, %arg3: memref<64x8xbf16, #tpu.memory_space<vmem>>, %arg4: memref<128x8xbf16, #tpu.memory_space<vmem>>, %arg5: memref<1x2x8xf32, #tpu.memory_space<vmem>>) attributes {dimension_semantics = [#tpu.dimension_semantics<parallel>, #tpu.dimension_semantics<parallel>], iteration_bounds = array<i64: 1, 1>, scalar_prefetch = 0 : i64, scratch_operands = 0 : i64, tpu.core_type = #tpu.core_type<tc>, window_params = [{transform_indices = @transform_0, window_bounds = array<i64: 128, 64>}, {transform_indices = @transform_1, window_bounds = array<i64: 64, 8>}, {transform_indices = @transform_2, window_bounds = array<i64: 128, 8>}, {transform_indices = @transform_3, window_bounds = array<i64: 1, 2, 8>}]} {
    %c0 = arith.constant 0 : index
    %c0_0 = arith.constant 0 : index
    %0 = vector.load %arg2[%c0, %c0_0] : memref<128x64xbf16, #tpu.memory_space<vmem>>, vector<128x64xbf16>
    %c0_1 = arith.constant 0 : index
    %c0_2 = arith.constant 0 : index
    %1 = vector.load %arg3[%c0_1, %c0_2] : memref<64x8xbf16, #tpu.memory_space<vmem>>, vector<64x8xbf16>
    %cst = arith.constant dense<0.000000e+00> : vector<128x8xf32>
    %2 = tpu.matmul %0, %1, %cst {dimension_numbers = #tpu.dot_dimension_numbers<[1], [0], [0], [1], [0, 0, 1, 1], [], []>} : vector<128x64xbf16>, vector<64x8xbf16>, vector<128x8xf32> -> vector<128x8xf32>
    %3 = arith.truncf %2 : vector<128x8xf32> to vector<128x8xbf16>
    %c0_3 = arith.constant 0 : index
    %c0_4 = arith.constant 0 : index
    %4 = vector.load %arg4[%c0_3, %c0_4] : memref<128x8xbf16, #tpu.memory_space<vmem>>, vector<128x8xbf16>
    tpu.vector_store %arg4[%c0_3, %c0_4], %3 {strides = array<i32>} : memref<128x8xbf16, #tpu.memory_space<vmem>>, vector<128x8xbf16>,
    %cst_5 = arith.constant dense<0.000000e+00> : vector<8xf32>
    %5 = vector.multi_reduction <add>, %2, %cst_5 [0] : vector<128x8xf32> to vector<8xf32>
    %6 = vector.shape_cast %5 : vector<8xf32> to vector<1x8xf32>
    %7 = vector.shape_cast %6 : vector<1x8xf32> to vector<1x1x8xf32>
    %c0_6 = arith.constant 0 : index
    %c0_7 = arith.constant 0 : index
    %c0_8 = arith.constant 0 : index
    %8 = vector.load %arg5[%c0_6, %c0_7, %c0_8] : memref<1x2x8xf32, #tpu.memory_space<vmem>>, vector<1x1x8xf32>
    tpu.vector_store %arg5[%c0_6, %c0_7, %c0_8], %7 {strides = array<i32>} : memref<1x2x8xf32, #tpu.memory_space<vmem>>, vector<1x1x8xf32>,
    %9 = arith.mulf %2, %2 : vector<128x8xf32>
    %cst_9 = arith.constant dense<0.000000e+00> : vector<8xf32>
    %10 = vector.multi_reduction <add>, %9, %cst_9 [0] : vector<128x8xf32> to vector<8xf32>
    %11 = vector.shape_cast %10 : vector<8xf32> to vector<1x8xf32>
    %12 = vector.shape_cast %11 : vector<1x8xf32> to vector<1x1x8xf32>
    %c0_10 = arith.constant 0 : index
    %c1 = arith.constant 1 : index
    %c0_11 = arith.constant 0 : index
    %13 = vector.load %arg5[%c0_10, %c1, %c0_11] : memref<1x2x8xf32, #tpu.memory_space<vmem>>, vector<1x1x8xf32>
    tpu.vector_store %arg5[%c0_10, %c1, %c0_11], %12 {strides = array<i32>} : memref<1x2x8xf32, #tpu.memory_space<vmem>>, vector<1x1x8xf32>,
    return
  }
  func.func @transform_0(%arg0: i32, %arg1: i32) -> (i32, i32) {
    %c0_i32 = arith.constant 0 : i32
    %c0_i32_0 = arith.constant 0 : i32
    return %arg0, %c0_i32 : i32, i32
  }
  func.func @transform_1(%arg0: i32, %arg1: i32) -> (i32, i32) {
    %c0_i32 = arith.constant 0 : i32
    %c0_i32_0 = arith.constant 0 : i32
    return %c0_i32, %arg1 : i32, i32
  }
  func.func @transform_2(%arg0: i32, %arg1: i32) -> (i32, i32) {
    %c0_i32 = arith.constant 0 : i32
    return %arg0, %arg1 : i32, i32
  }
  func.func @transform_3(%arg0: i32, %arg1: i32) -> (i32, i32, i32) {
    %c0_i32 = arith.constant 0 : i32
    %c0_i32_0 = arith.constant 0 : i32
    return %arg0, %c0_i32, %arg1 : i32, i32, i32
  }
}

module attributes {stable_mosaic.version = 11 : i64} {
  func.func @_bn_lrelu_kernel(%arg0: i32, %arg1: memref<128x8xbf16, #tpu.memory_space<vmem>>, %arg2: memref<1x8xf32, #tpu.memory_space<vmem>>, %arg3: memref<1x8xf32, #tpu.memory_space<vmem>>, %arg4: memref<128x8xf32, #tpu.memory_space<vmem>>) attributes {dimension_semantics = [#tpu.dimension_semantics<parallel>], iteration_bounds = array<i64: 1>, scalar_prefetch = 0 : i64, scratch_operands = 0 : i64, tpu.core_type = #tpu.core_type<tc>, window_params = [{transform_indices = @transform_0, window_bounds = array<i64: 128, 8>}, {pipeline_mode = #tpu.pipeline_mode<synchronous>, transform_indices = @transform_1, window_bounds = array<i64: 1, 8>}, {pipeline_mode = #tpu.pipeline_mode<synchronous>, transform_indices = @transform_2, window_bounds = array<i64: 1, 8>}, {transform_indices = @transform_3, window_bounds = array<i64: 128, 8>}]} {
    %c0 = arith.constant 0 : index
    %c0_0 = arith.constant 0 : index
    %0 = vector.load %arg1[%c0, %c0_0] : memref<128x8xbf16, #tpu.memory_space<vmem>>, vector<128x8xbf16>
    %1 = arith.extf %0 : vector<128x8xbf16> to vector<128x8xf32>
    %c0_1 = arith.constant 0 : index
    %c0_2 = arith.constant 0 : index
    %2 = vector.load %arg2[%c0_1, %c0_2] : memref<1x8xf32, #tpu.memory_space<vmem>>, vector<1x8xf32>
    %3 = vector.broadcast %2 : vector<1x8xf32> to vector<128x8xf32>
    %4 = arith.mulf %1, %3 : vector<128x8xf32>
    %c0_3 = arith.constant 0 : index
    %c0_4 = arith.constant 0 : index
    %5 = vector.load %arg3[%c0_3, %c0_4] : memref<1x8xf32, #tpu.memory_space<vmem>>, vector<1x8xf32>
    %6 = vector.broadcast %5 : vector<1x8xf32> to vector<128x8xf32>
    %7 = arith.addf %4, %6 : vector<128x8xf32>
    %cst = arith.constant 0.000000e+00 : f32
    %8 = vector.broadcast %cst : f32 to vector<128x8xf32>
    %9 = arith.cmpf ogt, %7, %8 : vector<128x8xf32>
    %cst_5 = arith.constant 2.000000e-01 : f32
    %10 = vector.broadcast %cst_5 : f32 to vector<128x8xf32>
    %11 = arith.mulf %10, %7 : vector<128x8xf32>
    %12 = arith.select %9, %7, %11 : vector<128x8xi1>, vector<128x8xf32>
    %c0_6 = arith.constant 0 : index
    %c0_7 = arith.constant 0 : index
    %13 = vector.load %arg4[%c0_6, %c0_7] : memref<128x8xf32, #tpu.memory_space<vmem>>, vector<128x8xf32>
    tpu.vector_store %arg4[%c0_6, %c0_7], %12 {strides = array<i32>} : memref<128x8xf32, #tpu.memory_space<vmem>>, vector<128x8xf32>,
    return
  }
  func.func @transform_0(%arg0: i32) -> (i32, i32) {
    %c0_i32 = arith.constant 0 : i32
    %c0_i32_0 = arith.constant 0 : i32
    return %arg0, %c0_i32 : i32, i32
  }
  func.func @transform_1(%arg0: i32) -> (i32, i32) {
    %c0_i32 = arith.constant 0 : i32
    %c0_i32_0 = arith.constant 0 : i32
    %c0_i32_1 = arith.constant 0 : i32
    return %c0_i32, %c0_i32_0 : i32, i32
  }
  func.func @transform_2(%arg0: i32) -> (i32, i32) {
    %c0_i32 = arith.constant 0 : i32
    %c0_i32_0 = arith.constant 0 : i32
    %c0_i32_1 = arith.constant 0 : i32
    return %c0_i32, %c0_i32_0 : i32, i32
  }
  func.func @transform_3(%arg0: i32) -> (i32, i32) {
    %c0_i32 = arith.constant 0 : i32
    %c0_i32_0 = arith.constant 0 : i32
    return %arg0, %c0_i32 : i32, i32
  }
}

</mosaic_0001>

<bundles_post_ra>
// kernel: basic_discriminator_block.3
= control target key start
LH: loop header
LB: loop body
LE: loop exit
PB: predicated region body
PF: predicated region fallthrough
CT: control target
= control target key end

     0   :  { %vm134_vm0 = vcmask 64512   ;;  %s346_s0 = inlined_call_operand.vmem [shape: bf16[128,8], index: 0, kind: input, shape index: {}]   ;;  %s347_s1 = inlined_call_operand.vmem [shape: f32[1,8], index: 1, kind: input, shape index: {}]   ;;  %s348_s2 = inlined_call_operand.vmem [shape: f32[1,8], index: 2, kind: input, shape index: {}]   ;;  %s349_s3 = inlined_call_operand.vmem [shape: f32[128,8], index: 3, kind: output, shape index: {}]  }
   0x1   :  { %v156_v0 = vld [vmem:[%s346_s0] sm:$0xff]   ;;  %v187_v5 = vld [vmem:[%s346_s0 + $0x8] sm:$0xff]   ;;  %v188_v8 = vld [vmem:[%s346_s0 + $0x10] sm:$0xff]  }
   0x2   :  { %v222_v1 = vld [vmem:[%s347_s1] ss:$0 sm:$0xff]  ;;  %v157_v2 = vunpack.c.l.bf16 %v156_v0  ;;  %v158_v4 = vunpack.c.h.bf16 %v156_v0  ;;  %v161_v6 = vunpack.c.l.bf16 %v187_v5  ;;  %v162_v7 = vunpack.c.h.bf16 %v187_v5  ;;  %v189_v9 = vld [vmem:[%s346_s0 + $0x18] sm:$0xff]   ;;  %v191_v39 = vld [vmem:[%s346_s0 + $0x28] sm:$0xff]  }
   0x3   :  { %v227_v3 = vld [vmem:[%s348_s2] ss:$0 sm:$0xff]  ;;  %v165_v12 = vunpack.c.l.bf16 %v188_v8  ;;  %v166_v13 = vunpack.c.h.bf16 %v188_v8  ;;  %v169_v16 = vunpack.c.l.bf16 %v189_v9  ;;  %v170_v17 = vunpack.c.h.bf16 %v189_v9  ;;  %v192_v42 = vld [vmem:[%s346_s0 + $0x30] sm:$0xff]   ;;  %v193_v49 = vld [vmem:[%s346_s0 + $0x38] sm:$0xff]  }
   0x4   :  { %v50_v10 = vmul.f32 %v222_v1, %v157_v2  ;;  %v51_v11 = vmul.f32 %v222_v1, %v158_v4  ;;  %v52_v14 = vmul.f32 %v222_v1, %v161_v6  ;;  %v53_v15 = vmul.f32 %v222_v1, %v162_v7  ;;  %v190_v26 = vld [vmem:[%s346_s0 + $0x20] sm:$0xff]  }
   0x5   :  { %v54_v20 = vmul.f32 %v222_v1, %v165_v12  ;;  %v55_v21 = vmul.f32 %v222_v1, %v166_v13  ;;  %v56_v24 = vmul.f32 %v222_v1, %v169_v16  ;;  %v57_v25 = vmul.f32 %v222_v1, %v170_v17 }
   0x6   :  { %v70_v18 = vadd.f32 %v227_v3, %v50_v10  ;;  %v71_v19 = vadd.f32 %v227_v3, %v51_v11  ;;  %v72_v22 = vadd.f32 %v227_v3, %v52_v14  ;;  %v73_v23 = vadd.f32 %v227_v3, %v53_v15 }
   0x7   :  { %v74_v33 = vadd.f32 %v227_v3, %v54_v20  ;;  %v75_v34 = vadd.f32 %v227_v3, %v55_v21  ;;  %v76_v37 = vadd.f32 %v227_v3, %v56_v24  ;;  %v77_v38 = vadd.f32 %v227_v3, %v57_v25 }
   0x8   :  { %vm86_vm1 = vcmp.gt.f32.partialorder %v70_v18, 0.0  ;;  %v102_v27 = vmul.f32 0.2, %v70_v18  ;;  %vm87_vm2 = vcmp.gt.f32.partialorder %v71_v19, 0.0  ;;  %v103_v28 = vmul.f32 0.2, %v71_v19 }
   0x9   :  { %vm88_vm3 = vcmp.gt.f32.partialorder %v72_v22, 0.0  ;;  %v104_v29 = vmul.f32 0.2, %v72_v22  ;;  %vm89_vm4 = vcmp.gt.f32.partialorder %v73_v23, 0.0  ;;  %v105_v30 = vmul.f32 0.2, %v73_v23 }
   0xa   :  { %v118_v31 = vsel %vm86_vm1, %v70_v18, %v102_v27  ;;  %v119_v32 = vsel %vm87_vm2, %v71_v19, %v103_v28  ;;  %vm90_vm5 = vcmp.gt.f32.partialorder %v74_v33, 0.0  ;;  %v106_v40 = vmul.f32 0.2, %v74_v33 }
   0xb   :  { %135 = vst.msk [vmem:[%s349_s3] sm:$0xff] %vm134_vm0, %v118_v31  ;;  %v120_v35 = vsel %vm88_vm3, %v72_v22, %v104_v29  ;;  %v121_v36 = vsel %vm89_vm4, %v73_v23, %v105_v30  ;;  %vm91_vm6 = vcmp.gt.f32.partialorder %v75_v34, 0.0  ;;  %v173_v41 = vunpack.c.l.bf16 %v190_v26 }
   0xc   :  { %136 = vst.msk [vmem:[%s349_s3 + $0x8] sm:$0xff] %vm134_vm0, %v119_v32  ;;  %v107_v43 = vmul.f32 0.2, %v75_v34  ;;  %vm92_vm7 = vcmp.gt.f32.partialorder %v76_v37, 0.0  ;;  %v108_v44 = vmul.f32 0.2, %v76_v37  ;;  %v174_v45 = vunpack.c.h.bf16 %v190_v26 }
   0xd   :  { %137 = vst.msk [vmem:[%s349_s3 + $0x10] sm:$0xff] %vm134_vm0, %v120_v35  ;;  %v122_v46 = vsel %vm90_vm5, %v74_v33, %v106_v40  ;;  %vm93_vm8 = vcmp.gt.f32.partialorder %v77_v38, 0.0  ;;  %v109_v47 = vmul.f32 0.2, %v77_v38  ;;  %v58_v48 = vmul.f32 %v222_v1, %v173_v41 }
   0xe   :  { %138 = vst.msk [vmem:[%s349_s3 + $0x18] sm:$0xff] %vm134_vm0, %v121_v36  ;;  %v123_v50 = vsel %vm91_vm6, %v75_v34, %v107_v43  ;;  %v124_v51 = vsel %vm92_vm7, %v76_v37, %v108_v44  ;;  %v59_v52 = vmul.f32 %v222_v1, %v174_v45  ;;  %v177_v53 = vunpack.c.l.bf16 %v191_v39 }
   0xf   :  { %139 = vst.msk [vmem:[%s349_s3 + $0x20] sm:$0xff] %vm134_vm0, %v122_v46  ;;  %v125_v54 = vsel %vm93_vm8, %v77_v38, %v109_v47  ;;  %v78_v55 = vadd.f32 %v227_v3, %v58_v48  ;;  %v178_v56 = vunpack.c.h.bf16 %v191_v39  ;;  %v181_v57 = vunpack.c.l.bf16 %v192_v42 }
  0x10   :  { %140 = vst.msk [vmem:[%s349_s3 + $0x28] sm:$0xff] %vm134_vm0, %v123_v50  ;;  %v79_v58 = vadd.f32 %v227_v3, %v59_v52  ;;  %v60_v59 = vmul.f32 %v222_v1, %v177_v53  ;;  %v182_v60 = vunpack.c.h.bf16 %v192_v42  ;;  %v185_v61 = vunpack.c.l.bf16 %v193_v49 }
  0x11   :  { %141 = vst.msk [vmem:[%s349_s3 + $0x30] sm:$0xff] %vm134_vm0, %v124_v51  ;;  %vm94_vm9 = vcmp.gt.f32.partialorder %v78_v55, 0.0  ;;  %v110_v62 = vmul.f32 0.2, %v78_v55  ;;  %v61_v63 = vmul.f32 %v222_v1, %v178_v56  ;;  %v62_v0 = vmul.f32 %v222_v1, %v181_v57 }
  0x12   :  { %142 = vst.msk [vmem:[%s349_s3 + $0x38] sm:$0xff] %vm134_vm0, %v125_v54  ;;  %vm95_vm10 = vcmp.gt.f32.partialorder %v79_v58, 0.0  ;;  %v111_v2 = vmul.f32 0.2, %v79_v58  ;;  %v80_v4 = vadd.f32 %v227_v3, %v60_v59  ;;  %v63_v5 = vmul.f32 %v222_v1, %v182_v60 }
  0x13   :  { %v126_v6 = vsel %vm94_vm9, %v78_v55, %v110_v62  ;;  %v81_v7 = vadd.f32 %v227_v3, %v61_v63  ;;  %v82_v8 = vadd.f32 %v227_v3, %v62_v0  ;;  %v64_v9 = vmul.f32 %v222_v1, %v185_v61 }
  0x14   :  { %143 = vst.msk [vmem:[%s349_s3 + $0x40] sm:$0xff] %vm134_vm0, %v126_v6  ;;  %v127_v10 = vsel %vm95_vm10, %v79_v58, %v111_v2  ;;  %vm96_vm11 = vcmp.gt.f32.partialorder %v80_v4, 0.0  ;;  %v112_v11 = vmul.f32 0.2, %v80_v4  ;;  %v83_v12 = vadd.f32 %v227_v3, %v63_v5 }
  0x15   :  { %144 = vst.msk [vmem:[%s349_s3 + $0x48] sm:$0xff] %vm134_vm0, %v127_v10  ;;  %vm97_vm12 = vcmp.gt.f32.partialorder %v81_v7, 0.0  ;;  %v113_v13 = vmul.f32 0.2, %v81_v7  ;;  %vm98_vm13 = vcmp.gt.f32.partialorder %v82_v8, 0.0  ;;  %v84_v14 = vadd.f32 %v227_v3, %v64_v9 }
  0x16   :  { %v128_v15 = vsel %vm96_vm11, %v80_v4, %v112_v11  ;;  %v114_v16 = vmul.f32 0.2, %v82_v8  ;;  %vm99_vm14 = vcmp.gt.f32.partialorder %v83_v12, 0.0  ;;  %v115_v17 = vmul.f32 0.2, %v83_v12 }
  0x17   :  { %145 = vst.msk [vmem:[%s349_s3 + $0x50] sm:$0xff] %vm134_vm0, %v128_v15  ;;  %v129_v18 = vsel %vm97_vm12, %v81_v7, %v113_v13  ;;  %vm100_vm15 = vcmp.gt.f32.partialorder %v84_v14, 0.0  ;;  %v116_v19 = vmul.f32 0.2, %v84_v14  ;;  %v186_v20 = vunpack.c.h.bf16 %v193_v49 }
  0x18   :  { %146 = vst.msk [vmem:[%s349_s3 + $0x58] sm:$0xff] %vm134_vm0, %v129_v18  ;;  %v130_v21 = vsel %vm98_vm13, %v82_v8, %v114_v16  ;;  %v131_v22 = vsel %vm99_vm14, %v83_v12, %v115_v17 }
  0x19   :  { %147 = vst.msk [vmem:[%s349_s3 + $0x60] sm:$0xff] %vm134_vm0, %v130_v21  ;;  %v132_v23 = vsel %vm100_vm15, %v84_v14, %v116_v19  ;;  %v65_v24 = vmul.f32 %v222_v1, %v186_v20 }
  0x1a   :  { %148 = vst.msk [vmem:[%s349_s3 + $0x68] sm:$0xff] %vm134_vm0, %v131_v22 }
  0x1b   :  { %149 = vst.msk [vmem:[%s349_s3 + $0x70] sm:$0xff] %vm134_vm0, %v132_v23  ;;  %v85_v25 = vadd.f32 %v227_v3, %v65_v24 }
  0x1d   :  { %vm101_vm1 = vcmp.gt.f32.partialorder %v85_v25, 0.0  ;;  %v117_v26 = vmul.f32 0.2, %v85_v25 }
  0x1f   :  { %v133_v27 = vsel %vm101_vm1, %v85_v25, %v117_v26 }
  0x20   :  { %150 = vst.msk [vmem:[%s349_s3 + $0x78] sm:$0xff] %vm134_vm0, %v133_v27 }

// kernel: basic_discriminator_block.2
= control target key start
LH: loop header
LB: loop body
LE: loop exit
PB: predicated region body
PF: predicated region fallthrough
CT: control target
= control target key end

     0   :  { %vm102_vm0 = vcmask 523264   ;;  %vm192_vm1 = vcmask 60416   ;;  %vm209_vm2 = vcmask 64512   ;;  %vm247_vm3 = vcmask 57344   ;;  %s592_s1 = inlined_call_operand.vmem [shape: bf16[64,8], index: 1, kind: input, shape index: {}]   ;;  %s593_s0 = inlined_call_operand.vmem [shape: bf16[128,64], index: 0, kind: input, shape index: {}]   ;;  %s594_s2 = inlined_call_operand.vmem [shape: bf16[128,8], index: 2, kind: output, shape index: {0}]   ;;  %s595_s3 = inlined_call_operand.vmem [shape: f32[1,2,8], index: 3, kind: output, shape index: {1}]  }
   0x1   :  { %v378_v0 = vld [vmem:[%s592_s1 + $0x18] sm:$0xff]  ;;  %v377_v1 = vld [vmem:[%s592_s1 + $0x10] sm:$0xff]  ;;  %v376_v2 = vld [vmem:[%s592_s1 + $0x8] sm:$0xff] }
   0x2   :  { %131 = vmatpush.bf16.msra.mxu0 %v378_v0  ;;  %379 = vmatpush.bf16.msra.mxu1 %v378_v0  ;;  %v375_v3 = vld [vmem:[%s592_s1] sm:$0xff]  ;;  %v369_v5 = vld [vmem:[%s593_s0 + $0x10] sm:$0xff]  ;;  %v368_v8 = vld [vmem:[%s593_s0 + $0x8] sm:$0xff] }
   0x3   :  { %380 = vmatpush.bf16.msra.mxu2 %v378_v0  ;;  %381 = vmatpush.bf16.msra.mxu3 %v378_v0  ;;  %v367_v4 = vld [vmem:[%s593_s0] sm:$0xff]  ;;  %v373_v7 = vld [vmem:[%s593_s0 + $0x30] sm:$0xff]  ;;  %v370_v9 = vld [vmem:[%s593_s0 + $0x18] sm:$0xff] }
   0x4   :  { %v371_v6 = vld [vmem:[%s593_s0 + $0x20] sm:$0xff]  ;;  %v372_v10 = vld [vmem:[%s593_s0 + $0x28] sm:$0xff]  ;;  %v374_v11 = vld [vmem:[%s593_s0 + $0x38] sm:$0xff] }
   0x6   :  { %132 = vmatpush.bf16.msra.mxu0 %v377_v1  ;;  %382 = vmatpush.bf16.msra.mxu1 %v377_v1 }
   0x7   :  { %383 = vmatpush.bf16.msra.mxu2 %v377_v1  ;;  %384 = vmatpush.bf16.msra.mxu3 %v377_v1 }
   0xa   :  { %133 = vmatpush.bf16.msra.mxu0 %v376_v2  ;;  %385 = vmatpush.bf16.msra.mxu1 %v376_v2 }
   0xb   :  { %386 = vmatpush.bf16.msra.mxu2 %v376_v2  ;;  %387 = vmatpush.bf16.msra.mxu3 %v376_v2 }
   0xe   :  { %134 = vmatpush.bf16.msra.mxu0 %v375_v3  ;;  %388 = vmatpush.bf16.msra.mxu1 %v375_v3 }
   0xf   :  { %389 = vmatpush.bf16.msra.mxu2 %v375_v3  ;;  %390 = vmatpush.bf16.msra.mxu3 %v375_v3 }
  0x11   :  { %359 = vmatmul.msk.bf16.vlgmr.msra.gmra.mxu0 %vm102_vm0, %v367_v4  ;;  %361 = vmatmul.msk.bf16.vlgmr.msra.gmra.mxu1 %vm102_vm0, %v369_v5 }
  0x12   :  { %363 = vmatmul.msk.bf16.vlgmr.msra.gmra.mxu2 %vm102_vm0, %v371_v6  ;;  %365 = vmatmul.msk.bf16.vlgmr.msra.gmra.mxu3 %vm102_vm0, %v373_v7 }
  0x21   :  { %360 = vmatmul.msk.bf16.gmra.mxu0 %vm102_vm0, %v368_v8  ;;  %362 = vmatmul.msk.bf16.gmra.mxu1 %vm102_vm0, %v370_v9 }
  0x22   :  { %364 = vmatmul.msk.bf16.gmra.mxu2 %vm102_vm0, %v372_v10  ;;  %366 = vmatmul.msk.bf16.gmra.mxu3 %vm102_vm0, %v374_v11 }
  0x8e   :  { %v136_v12 = vpop.f32.mrf.mxu0  ;;  %v146_v13 = vpop.f32.mrf.mxu1 }
  0x8f   :  { %v176_v14 = vpack.c.bf16 %v136_v12, %v136_v12  ;;  %v180_v15 = vpack.c.bf16 %v146_v13, %v146_v13  ;;  %v249_v33 = vmul.f32 %v136_v12, %v136_v12  ;;  %v210_v36 = vsel %vm209_vm2, %v136_v12, 0.0 }
  0x90   :  { %v253_v41 = vmul.f32 %v146_v13, %v146_v13  ;;  %v217_v57 = vsel %vm209_vm2, %v146_v13, 0.0 }
  0x91   :  { %193 = vst.msk [vmem:[%s594_s2] sm:$0xf] %vm192_vm1, %v176_v14  ;;  %v265_v40 = vsel %vm209_vm2, %v249_v33, 0.0 }
  0x92   :  { %197 = vst.msk [vmem:[%s594_s2 + $0x10] sm:$0xf] %vm192_vm1, %v180_v15  ;;  %v272_v62 = vsel %vm209_vm2, %v253_v41, 0.0 }
  0x95   :  { %v463_v16 = vpop.f32.mrf.mxu2  ;;  %v465_v17 = vpop.f32.mrf.mxu3 }
  0x96   :  { %v138_v18 = vpop.f32.mrf.mxu0  ;;  %v148_v19 = vpop.f32.mrf.mxu1  ;;  %v184_v20 = vpack.c.bf16 %v463_v16, %v463_v16  ;;  %v188_v23 = vpack.c.bf16 %v465_v17, %v465_v17  ;;  %v257_v11 = vmul.f32 %v463_v16, %v463_v16 }
  0x97   :  { %v177_v21 = vpack.c.bf16 %v138_v18, %v138_v18  ;;  %v181_v22 = vpack.c.bf16 %v148_v19, %v148_v19  ;;  %v250_v29 = vmul.f32 %v138_v18, %v138_v18  ;;  %v211_v34 = vsel %vm209_vm2, %v138_v18, 0.0 }
  0x98   :  { %201 = vst.msk [vmem:[%s594_s2 + $0x20] sm:$0xf] %vm192_vm1, %v184_v20  ;;  %v212_v39 = vadd.f32 %v211_v34, %v210_v36  ;;  %v254_v58 = vmul.f32 %v148_v19, %v148_v19  ;;  %v219_v63 = vsel %vm209_vm2, %v148_v19, 0.0  ;;  %v225_v19 = vsel %vm209_vm2, %v463_v16, 0.0 }
  0x99   :  { %194 = vst.msk [vmem:[%s594_s2 + $0x4] sm:$0xf] %vm192_vm1, %v177_v21  ;;  %v266_v37 = vsel %vm209_vm2, %v250_v29, 0.0 }
  0x9a   :  { %198 = vst.msk [vmem:[%s594_s2 + $0x14] sm:$0xf] %vm192_vm1, %v181_v22  ;;  %v267_v45 = vadd.f32 %v266_v37, %v265_v40  ;;  %v274_v3 = vsel %vm209_vm2, %v254_v58, 0.0 }
  0x9b   :  { %205 = vst.msk [vmem:[%s594_s2 + $0x30] sm:$0xf] %vm192_vm1, %v188_v23 }
  0x9d   :  { %v487_v24 = vpop.f32.mrf.mxu2  ;;  %v489_v25 = vpop.f32.mrf.mxu3 }
  0x9e   :  { %v141_v26 = vpop.f32.mrf.mxu0  ;;  %v151_v27 = vpop.f32.mrf.mxu1  ;;  %v185_v28 = vpack.c.bf16 %v487_v24, %v487_v24  ;;  %v189_v32 = vpack.c.bf16 %v489_v25, %v489_v25  ;;  %v258_v20 = vmul.f32 %v487_v24, %v487_v24  ;;  %v262_v40 = vmul.f32 %v489_v25, %v489_v25 }
  0x9f   :  { %v178_v30 = vpack.c.bf16 %v141_v26, %v141_v26  ;;  %v182_v31 = vpack.c.bf16 %v151_v27, %v151_v27  ;;  %v251_v35 = vmul.f32 %v141_v26, %v141_v26  ;;  %v213_v38 = vsel %vm209_vm2, %v141_v26, 0.0 }
  0xa0   :  { %202 = vst.msk [vmem:[%s594_s2 + $0x24] sm:$0xf] %vm192_vm1, %v185_v28  ;;  %v214_v46 = vadd.f32 %v213_v38, %v212_v39  ;;  %v255_v0 = vmul.f32 %v151_v27, %v151_v27  ;;  %v221_v4 = vsel %vm209_vm2, %v151_v27, 0.0  ;;  %v280_v26 = vsel %vm209_vm2, %v257_v11, 0.0 }
  0xa1   :  { %195 = vst.msk [vmem:[%s594_s2 + $0x8] sm:$0xf] %vm192_vm1, %v178_v30  ;;  %v268_v42 = vsel %vm209_vm2, %v251_v35, 0.0  ;;  %v227_v27 = vsel %vm209_vm2, %v487_v24, 0.0  ;;  %v282_v30 = vsel %vm209_vm2, %v258_v20, 0.0  ;;  %v261_v35 = vmul.f32 %v465_v17, %v465_v17 }
  0xa2   :  { %199 = vst.msk [vmem:[%s594_s2 + $0x18] sm:$0xf] %vm192_vm1, %v182_v31  ;;  %v269_v55 = vadd.f32 %v268_v42, %v267_v45  ;;  %v276_v12 = vsel %vm209_vm2, %v255_v0, 0.0  ;;  %v233_v24 = vsel %vm209_vm2, %v465_v17, 0.0 }
  0xa3   :  { %206 = vst.msk [vmem:[%s594_s2 + $0x34] sm:$0xf] %vm192_vm1, %v189_v32  ;;  %v288_v45 = vsel %vm209_vm2, %v261_v35, 0.0 }
  0xa5   :  { %v161_v43 = vpop.f32.mrf.mxu2  ;;  %v517_v44 = vpop.f32.mrf.mxu3 }
  0xa6   :  { %v143_v47 = vpop.f32.mrf.mxu0  ;;  %v153_v48 = vpop.f32.mrf.mxu1  ;;  %v186_v49 = vpack.c.bf16 %v161_v43, %v161_v43  ;;  %v190_v50 = vpack.c.bf16 %v517_v44, %v517_v44  ;;  %v259_v28 = vmul.f32 %v161_v43, %v161_v43  ;;  %v229_v31 = vsel %vm209_vm2, %v161_v43, 0.0 }
  0xa7   :  { %v179_v51 = vpack.c.bf16 %v143_v47, %v143_v47  ;;  %v215_v52 = vsel %vm209_vm2, %v143_v47, 0.0  ;;  %v252_v53 = vmul.f32 %v143_v47, %v143_v47  ;;  %v183_v54 = vpack.c.bf16 %v153_v48, %v153_v48 }
  0xa8   :  { %v216_v56 = vadd.f32 %v215_v52, %v214_v46  ;;  %203 = vst.msk [vmem:[%s594_s2 + $0x28] sm:$0xf] %vm192_vm1, %v186_v49  ;;  %v256_v5 = vmul.f32 %v153_v48, %v153_v48  ;;  %v223_v13 = vsel %vm209_vm2, %v153_v48, 0.0  ;;  %v284_v36 = vsel %vm209_vm2, %v259_v28, 0.0 }
  0xa9   :  { %196 = vst.msk [vmem:[%s594_s2 + $0xc] sm:$0xf] %vm192_vm1, %v179_v51  ;;  %v270_v59 = vsel %vm209_vm2, %v252_v53, 0.0  ;;  %v235_v46 = vsel %vm209_vm2, %v489_v25, 0.0  ;;  %v263_v47 = vmul.f32 %v517_v44, %v517_v44  ;;  %v237_v17 = vsel %vm209_vm2, %v517_v44, 0.0 }
  0xaa   :  { %v218_v60 = vadd.f32 %v217_v57, %v216_v56  ;;  %v271_v61 = vadd.f32 %v270_v59, %v269_v55  ;;  %200 = vst.msk [vmem:[%s594_s2 + $0x1c] sm:$0xf] %vm192_vm1, %v183_v54  ;;  %v278_v21 = vsel %vm209_vm2, %v256_v5, 0.0 }
  0xab   :  { %207 = vst.msk [vmem:[%s594_s2 + $0x38] sm:$0xf] %vm192_vm1, %v190_v50  ;;  %v290_v50 = vsel %vm209_vm2, %v262_v40, 0.0  ;;  %v292_v54 = vsel %vm209_vm2, %v263_v47, 0.0 }
  0xac   :  { %v273_v1 = vadd.f32 %v272_v62, %v271_v61  ;;  %v220_v2 = vadd.f32 %v219_v63, %v218_v60 }
  0xad   :  { %v163_v6 = vpop.f32.mrf.mxu2  ;;  %v173_v7 = vpop.f32.mrf.mxu3 }
  0xae   :  { %v222_v8 = vadd.f32 %v221_v4, %v220_v2  ;;  %v275_v9 = vadd.f32 %v274_v3, %v273_v1  ;;  %v187_v10 = vpack.c.bf16 %v163_v6, %v163_v6  ;;  %v191_v14 = vpack.c.bf16 %v173_v7, %v173_v7 }
  0xaf   :  { %v260_v32 = vmul.f32 %v163_v6, %v163_v6  ;;  %v231_v37 = vsel %vm209_vm2, %v163_v6, 0.0  ;;  %v264_v51 = vmul.f32 %v173_v7, %v173_v7  ;;  %v239_v55 = vsel %vm209_vm2, %v173_v7, 0.0 }
  0xb0   :  { %v224_v15 = vadd.f32 %v223_v13, %v222_v8  ;;  %v277_v18 = vadd.f32 %v276_v12, %v275_v9  ;;  %204 = vst.msk [vmem:[%s594_s2 + $0x2c] sm:$0xf] %vm192_vm1, %v187_v10 }
  0xb1   :  { %208 = vst.msk [vmem:[%s594_s2 + $0x3c] sm:$0xf] %vm192_vm1, %v191_v14  ;;  %v286_v41 = vsel %vm209_vm2, %v260_v32, 0.0  ;;  %v294_v25 = vsel %vm209_vm2, %v264_v51, 0.0 }
  0xb2   :  { %v226_v22 = vadd.f32 %v225_v19, %v224_v15  ;;  %v279_v23 = vadd.f32 %v278_v21, %v277_v18 }
  0xb4   :  { %v281_v29 = vadd.f32 %v280_v26, %v279_v23  ;;  %v228_v16 = vadd.f32 %v227_v27, %v226_v22 }
  0xb6   :  { %v230_v33 = vadd.f32 %v229_v31, %v228_v16  ;;  %v283_v34 = vadd.f32 %v282_v30, %v281_v29 }
  0xb8   :  { %v285_v38 = vadd.f32 %v284_v36, %v283_v34  ;;  %v232_v39 = vadd.f32 %v231_v37, %v230_v33 }
  0xba   :  { %v234_v42 = vadd.f32 %v233_v24, %v232_v39  ;;  %v287_v43 = vadd.f32 %v286_v41, %v285_v38 }
  0xbc   :  { %v289_v48 = vadd.f32 %v288_v45, %v287_v43  ;;  %v236_v49 = vadd.f32 %v235_v46, %v234_v42 }
  0xbe   :  { %v238_v52 = vadd.f32 %v237_v17, %v236_v49  ;;  %v291_v53 = vadd.f32 %v290_v50, %v289_v48 }
  0xc0   :  { %v293_v56 = vadd.f32 %v292_v54, %v291_v53  ;;  %v240_v57 = vadd.f32 %v239_v55, %v238_v52 }
  0xc2   :  { %v241_v58 = vrot.slane %v240_v57, 4  ;;  %v295_v59 = vadd.f32 %v294_v25, %v293_v56 }
  0xc4   :  { %v242_v60 = vadd.f32 %v241_v58, %v240_v57  ;;  %v296_v61 = vrot.slane %v295_v59, 4 }
  0xc6   :  { %v243_v62 = vrot.slane %v242_v60, 2  ;;  %v297_v63 = vadd.f32 %v296_v61, %v295_v59 }
  0xc8   :  { %v244_v0 = vadd.f32 %v243_v62, %v242_v60  ;;  %v298_v1 = vrot.slane %v297_v63, 2 }
  0xca   :  { %v245_v44 = vrot.slane %v244_v0, 1  ;;  %v299_v2 = vadd.f32 %v298_v1, %v297_v63 }
  0xcc   :  { %v246_v3 = vadd.f32 %v245_v44, %v244_v0  ;;  %v300_v4 = vrot.slane %v299_v2, 1 }
  0xce   :  { %248 = vst.msk [vmem:[%s595_s3] sm:$0x1] %vm247_vm3, %v246_v3  ;;  %v301_v5 = vadd.f32 %v300_v4, %v299_v2 }
  0xd0   :  { %302 = vst.msk [vmem:[%s595_s3 + $0x1] sm:$0x1] %vm247_vm3, %v301_v5 }

</bundles_post_ra>
